<compile_context>
chip_gen: v7x
topology: tpu7x:2x2x1
jax: 0.10.0
libtpu: 0.0.40
codegen_flags: <defaults>
</compile_context>

<pallas_src>
import functools

import jax
import jax.numpy as jnp
from jax import lax
from jax.experimental import pallas as pl
from jax.experimental.pallas import tpu as pltpu

F32 = jnp.float32
BF16 = jnp.bfloat16


def _round_up(x: int, m: int) -> int:
    return ((x + m - 1) // m) * m


def _cp(semantics):
    return pltpu.CompilerParams(
        dimension_semantics=tuple(semantics),
        vmem_limit_bytes=48 << 20,      # safe for v7x (64 MiB/core) and v5e/v6e
    )


# ---------------------------------------------------------------------------
# Pallas kernels
# ---------------------------------------------------------------------------
def _matmul_kernel(a_ref, b_ref, bias_ref, o_ref, *, relu):
    acc = jnp.dot(a_ref[...], b_ref[...], preferred_element_type=jnp.float32)
    acc = acc + bias_ref[...]
    if relu:
        acc = jnp.maximum(acc, 0.0)
    o_ref[...] = acc.astype(o_ref.dtype)


def _matmul_res_kernel(a_ref, b_ref, bias_ref, r_ref, o_ref, *, relu):
    # conv3 of a bottleneck: matmul + bias + residual + ReLU fused.
    acc = jnp.dot(a_ref[...], b_ref[...], preferred_element_type=jnp.float32)
    acc = acc + bias_ref[...] + r_ref[...].astype(jnp.float32)
    if relu:
        acc = jnp.maximum(acc, 0.0)
    o_ref[...] = acc.astype(o_ref.dtype)


def _conv_taps_kernel(x_ref, w_ref, bias_ref, o_ref, *, offsets, m, relu):
    # x_ref   : (1, P, L, IC)  flattened parity planes (bf16)
    # w_ref   : (T, IC, OC)    one (IC, OC) weight slab per tap (bf16)
    # bias_ref: (1, OC)        f32 (BN folded)
    # o_ref   : (1, m, OC)     m = oh * padded_width rows (junk cols cut later)
    acc = None
    for t, (p, off) in enumerate(offsets):
        lhs = x_ref[0, p, pl.ds(off, m), :]
        c = jnp.dot(lhs, w_ref[t], preferred_element_type=jnp.float32)
        acc = c if acc is None else acc + c
    acc = acc + bias_ref[...]
    if relu:
        acc = jnp.maximum(acc, 0.0)
    o_ref[0] = acc.astype(o_ref.dtype)


def _pool_taps_kernel(x_ref, o_ref, *, offsets, m):
    # Elementwise maximum chain over the 9 shifted views (pure VPU).
    out = None
    for (p, off) in offsets:
        v = x_ref[0, p, pl.ds(off, m), :]
        out = v if out is None else jnp.maximum(out, v)
    o_ref[0] = out


def _avgpool_fc_kernel(x_ref, w_ref, bias_ref, o_ref):
    # x_ref: (N, HW, C) bf16; w_ref: (C, Np) bf16; bias: (1, Np) f32
    feat = jnp.mean(x_ref[...].astype(jnp.float32), axis=1)        # (N, C)
    logits = jnp.dot(feat.astype(jnp.bfloat16), w_ref[...],
                     preferred_element_type=jnp.float32)
    o_ref[...] = (logits + bias_ref[...]).astype(o_ref.dtype)


# ---------------------------------------------------------------------------
# Pallas wrappers
# ---------------------------------------------------------------------------
def matmul_bias(a, b, bias, *, relu, residual=None, out_dtype=BF16):
    """a:(M,K) @ b:(K,N) + bias (+ residual, + ReLU).  bf16 operands, f32 acc."""
    M, K = a.shape
    Kb, N = b.shape
    assert K == Kb
    a = a.astype(BF16)
    b = b.astype(BF16)
    bias = bias.reshape(1, N).astype(F32)

    # N tiling (parallel axis; helps v7x dual-core on small-M layers).
    Np = N if (N < 128 or N % 128 == 0) else _round_up(N, 128)
    tn = 256 if (Np > 256 and Np % 256 == 0) else Np
    # M tiling: tm=256 fills the 256-wide MXU of v6e/v7x (fine on v5e too).
    if M >= 256:
        tm = 256
        Mp = _round_up(M, 256)
    else:
        Mp = max(_round_up(M, 8), 8)
        tm = Mp

    if Mp != M:
        a = jnp.pad(a, ((0, Mp - M), (0, 0)))
    if Np != N:
        b = jnp.pad(b, ((0, 0), (0, Np - N)))
        bias = jnp.pad(bias, ((0, 0), (0, Np - N)))

    in_specs = [
        pl.BlockSpec((tm, K), lambda i, j: (i, 0)),
        pl.BlockSpec((K, tn), lambda i, j: (0, j)),
        pl.BlockSpec((1, tn), lambda i, j: (0, j)),
    ]
    operands = [a, b, bias]
    if residual is None:
        kernel = functools.partial(_matmul_kernel, relu=relu)
    else:
        r = residual.astype(BF16)
        if Mp != M or Np != N:
            r = jnp.pad(r, ((0, Mp - M), (0, Np - N)))
        in_specs.append(pl.BlockSpec((tm, tn), lambda i, j: (i, j)))
        operands.append(r)
        kernel = functools.partial(_matmul_res_kernel, relu=relu)

    out = pl.pallas_call(
        kernel,
        out_shape=jax.ShapeDtypeStruct((Mp, Np), out_dtype),
        grid=(Mp // tm, Np // tn),
        in_specs=in_specs,
        out_specs=pl.BlockSpec((tm, tn), lambda i, j: (i, j)),
        compiler_params=_cp(("parallel", "parallel")),
    )(*operands)
    if Mp != M or Np != N:
        out = out[:M, :N]
    return out


def _build_planes(x_pad, stride, oh, ow, kh, kw, fill):
    """Split padded NHWC into stride^2 parity planes, flattened row-major.

    Returns (planes, offsets, m, pw):
      planes : (N, stride*stride, L, C)
      offsets: per-tap (plane_index, flat_row_offset) — static Python ints
      m      : rows computed by the kernel (= oh * pw, incl. junk columns)
      pw     : padded plane width (columns >= ow are junk, sliced off later)
    """
    N, Hp, Wp, C = x_pad.shape
    if stride == 1:
        ph, pw = Hp, Wp
        planes = x_pad.reshape(N, 1, Hp * Wp, C)
    else:
        ph = oh + (kh - 1) // stride
        pw = ow + (kw - 1) // stride
        planes_list = []
        for a in range(stride):
            for b in range(stride):
                p = x_pad[:, a::stride, b::stride, :][:, :ph, :pw, :]
                dh, dw = ph - p.shape[1], pw - p.shape[2]
                if dh > 0 or dw > 0:
                    p = jnp.pad(p, ((0, 0), (0, dh), (0, dw), (0, 0)),
                                constant_values=fill)
                planes_list.append(p)
        planes = jnp.stack(planes_list, axis=1).reshape(
            N, stride * stride, ph * pw, C)

    offsets = []
    for khi in range(kh):
        for kwi in range(kw):
            if stride == 1:
                p_idx, dh, dw = 0, khi, kwi
            else:
                p_idx = (khi % stride) * stride + (kwi % stride)
                dh, dw = khi // stride, kwi // stride
            offsets.append((p_idx, dh * pw + dw))

    m = oh * pw
    need = max(off for _, off in offsets) + m
    if need > planes.shape[2]:     # only junk columns ever read the overhang
        planes = jnp.pad(planes,
                         ((0, 0), (0, 0), (0, need - planes.shape[2]), (0, 0)),
                         constant_values=fill)
    return planes, tuple(offsets), m, pw


def conv2d_taps(x, w_oihw, bias, *, stride, padding, relu):
    """KxK conv (NHWC in/out), taps accumulated inside the kernel. No im2col."""
    N, H, W, IC = x.shape
    OC, IC2, KH, KW = w_oihw.shape
    assert IC == IC2
    OH = (H + 2 * padding - KH) // stride + 1
    OW = (W + 2 * padding - KW) // stride + 1
    x_pad = jnp.pad(x.astype(BF16),
                    ((0, 0), (padding, padding), (padding, padding), (0, 0)))
    planes, offsets, m, pw = _build_planes(x_pad, stride, OH, OW, KH, KW, 0.0)
    w = jnp.transpose(w_oihw, (2, 3, 1, 0)).reshape(KH * KW, IC, OC).astype(BF16)
    b2 = bias.reshape(1, OC).astype(F32)

    out = pl.pallas_call(
        functools.partial(_conv_taps_kernel, offsets=offsets, m=m, relu=relu),
        out_shape=jax.ShapeDtypeStruct((N, m, OC), BF16),
        grid=(N,),
        in_specs=[
            pl.BlockSpec((1,) + planes.shape[1:], lambda n: (n, 0, 0, 0)),
            pl.BlockSpec(w.shape, lambda n: (0, 0, 0)),
            pl.BlockSpec((1, OC), lambda n: (0, 0)),
        ],
        out_specs=pl.BlockSpec((1, m, OC), lambda n: (n, 0, 0)),
        compiler_params=_cp(("parallel",)),
    )(planes, w, b2)
    # Drop the junk columns produced by the full-padded-width formulation.
    return out.reshape(N, OH, pw, OC)[:, :, :OW, :]


def maxpool3x3_s2(x):
    """3x3 / stride 2 / pad 1 max-pool, NHWC, elementwise-max taps kernel."""
    N, H, W, C = x.shape
    OH = (H + 2 - 3) // 2 + 1
    OW = (W + 2 - 3) // 2 + 1
    x_pad = jnp.pad(x, ((0, 0), (1, 1), (1, 1), (0, 0)),
                    constant_values=-jnp.inf)
    planes, offsets, m, pw = _build_planes(x_pad, 2, OH, OW, 3, 3, -jnp.inf)
    out = pl.pallas_call(
        functools.partial(_pool_taps_kernel, offsets=offsets, m=m),
        out_shape=jax.ShapeDtypeStruct((N, m, C), x.dtype),
        grid=(N,),
        in_specs=[pl.BlockSpec((1,) + planes.shape[1:], lambda n: (n, 0, 0, 0))],
        out_specs=pl.BlockSpec((1, m, C), lambda n: (n, 0, 0)),
        compiler_params=_cp(("parallel",)),
    )(planes)
    return out.reshape(N, OH, pw, C)[:, :, :OW, :]


def avgpool_fc(x, fc_w, fc_b):
    """Fused global average pool + final FC.  x: NHWC bf16 -> (N, 1000) f32."""
    N, H, W, C = x.shape
    HW = H * W
    x2 = x.reshape(N, HW, C).astype(BF16)
    NOUT = fc_w.shape[0]
    Np = _round_up(NOUT, 128)
    w = fc_w.T.astype(BF16)
    b = fc_b.reshape(1, NOUT).astype(F32)
    if Np != NOUT:
        w = jnp.pad(w, ((0, 0), (0, Np - NOUT)))
        b = jnp.pad(b, ((0, 0), (0, Np - NOUT)))
    out = pl.pallas_call(
        _avgpool_fc_kernel,
        out_shape=jax.ShapeDtypeStruct((N, Np), F32),
        grid=(1,),
        in_specs=[
            pl.BlockSpec((N, HW, C), lambda i: (0, 0, 0)),
            pl.BlockSpec((C, Np), lambda i: (0, 0)),
            pl.BlockSpec((1, Np), lambda i: (0, 0)),
        ],
        out_specs=pl.BlockSpec((N, Np), lambda i: (0, 0)),
        compiler_params=_cp(("arbitrary",)),
    )(x2, w, b)
    return out[:, :NOUT]


# ---------------------------------------------------------------------------
# ResNet-50 building blocks
# ---------------------------------------------------------------------------
def fold_bn(cb, eps=1e-5):
    """Fold inference BatchNorm into the conv weight/bias (OIHW weight, f32)."""
    scale = cb["gamma"] / jnp.sqrt(cb["var"] + eps)
    w = cb["w"] * scale[:, None, None, None]
    b = cb["beta"] - cb["mean"] * scale
    return w, b


def _w_1x1(w_oihw):
    oc, ic = w_oihw.shape[0], w_oihw.shape[1]
    return w_oihw.reshape(oc, ic).T          # (IC, OC)


def conv_stem(x, w_oihw, bias):
    """7x7 / stride 2 / pad 3 stem conv.  IC=3 so the im2col stays tiny (K=147)."""
    N, H, W, IC = x.shape
    OC, _, KH, KW = w_oihw.shape
    stride, padding = 2, 3
    OH = (H + 2 * padding - KH) // stride + 1
    OW = (W + 2 * padding - KW) // stride + 1
    xp = jnp.pad(x, ((0, 0), (padding, padding), (padding, padding), (0, 0)))
    cols = []
    for kh in range(KH):
        for kw in range(KW):
            cols.append(xp[:, kh:kh + stride * (OH - 1) + 1:stride,
                              kw:kw + stride * (OW - 1) + 1:stride, :])
    a = jnp.concatenate(cols, axis=-1).reshape(N * OH * OW, KH * KW * IC)
    wmat = jnp.transpose(w_oihw, (2, 3, 1, 0)).reshape(KH * KW * IC, OC)
    out = matmul_bias(a, wmat, bias, relu=True, out_dtype=BF16)
    return out.reshape(N, OH, OW, OC)


def bottleneck(x, blk, *, stride):
    N, H, W, Cin = x.shape
    w1, b1 = fold_bn(blk["conv1"])
    width = w1.shape[0]
    out = matmul_bias(x.reshape(N * H * W, Cin), _w_1x1(w1), b1,
                      relu=True, out_dtype=BF16).reshape(N, H, W, width)

    w2, b2 = fold_bn(blk["conv2"])
    out = conv2d_taps(out, w2, b2, stride=stride, padding=1, relu=True)
    _, OH, OW, _ = out.shape

    if "downsample" in blk:
        wd, bd = fold_bn(blk["downsample"])
        xs = x[:, ::stride, ::stride, :] if stride > 1 else x
        identity = matmul_bias(xs.reshape(N * OH * OW, Cin), _w_1x1(wd), bd,
                               relu=False, out_dtype=BF16)
    else:
        identity = x.reshape(N * H * W, Cin)

    w3, b3 = fold_bn(blk["conv3"])
    Cout = w3.shape[0]
    out = matmul_bias(out.reshape(N * OH * OW, width), _w_1x1(w3), b3,
                      relu=True, residual=identity, out_dtype=BF16)
    return out.reshape(N, OH, OW, Cout)


_LAYER_CFG = [(3, 64, 1), (4, 128, 2), (6, 256, 2), (3, 512, 2)]


def resnet50_forward(params, image_ids):
    # image_ids: NCHW float (PyTorch convention) -> NHWC bf16 internally.
    x = jnp.transpose(image_ids, (0, 2, 3, 1)).astype(BF16)
    w, b = fold_bn(params["conv1"])
    x = conv_stem(x, w, b)
    x = maxpool3x3_s2(x)
    for layer_idx, (nblocks, _width, stride) in enumerate(_LAYER_CFG):
        blocks = params["layers"][layer_idx]
        for bi in range(nblocks):
            x = bottleneck(x, blocks[bi], stride=(stride if bi == 0 else 1))
    return avgpool_fc(x, params["fc_w"], params["fc_b"])       # (N, 1000) f32


# ---------------------------------------------------------------------------
# Deterministic parameter initialization (synthetic "pretrained" weights)
# ---------------------------------------------------------------------------
def _conv_bn_params(key, ic, oc, k):
    kw_, kg, kb, km, kv = jax.random.split(key, 5)
    std = (2.0 / (ic * k * k)) ** 0.5
    return dict(
        w=jax.random.normal(kw_, (oc, ic, k, k), F32) * std,
        gamma=1.0 + 0.1 * jax.random.normal(kg, (oc,), F32),
        beta=0.05 * jax.random.normal(kb, (oc,), F32),
        mean=0.05 * jax.random.normal(km, (oc,), F32),
        var=1.0 + 0.1 * jnp.abs(jax.random.normal(kv, (oc,), F32)),
    )


def init_resnet50_params(seed=0):
    key = jax.random.PRNGKey(seed)
    counter = [0]

    def nk():
        counter[0] += 1
        return jax.random.fold_in(key, counter[0])

    p = {"conv1": _conv_bn_params(nk(), 3, 64, 7), "layers": []}
    in_ch = 64
    for (nblocks, width, _stride) in _LAYER_CFG:
        out_ch = width * 4
        blocks = []
        for bi in range(nblocks):
            blk = {
                "conv1": _conv_bn_params(nk(), in_ch, width, 1),
                "conv2": _conv_bn_params(nk(), width, width, 3),
                "conv3": _conv_bn_params(nk(), width, out_ch, 1),
            }
            if bi == 0:
                blk["downsample"] = _conv_bn_params(nk(), in_ch, out_ch, 1)
            blocks.append(blk)
            in_ch = out_ch
        p["layers"].append(blocks)
    kfw, kfb = jax.random.split(nk())
    p["fc_w"] = jax.random.normal(kfw, (1000, 2048), F32) * (1.0 / 2048 ** 0.5)
    p["fc_b"] = 0.01 * jax.random.normal(kfb, (1000,), F32)
    return p


# ---------------------------------------------------------------------------
if __name__ == "__main__":
    key = jax.random.PRNGKey(0)

    # --- matmul(+bias+relu) kernel vs reference (bf16 operands, f32 accum).
    ka, kb, kc, kr = jax.random.split(key, 4)
    a_t = jax.random.normal(ka, (37, 96), F32).astype(BF16).astype(F32)
    b_t = jax.random.normal(kb, (96, 200), F32).astype(BF16).astype(F32)
    bias_t = jax.random.normal(kc, (200,), F32)
    got = matmul_bias(a_t, b_t, bias_t, relu=True, out_dtype=F32)
    want = jnp.maximum(a_t @ b_t + bias_t[None, :], 0.0)
    assert jnp.allclose(got, want, atol=5e-2, rtol=5e-2), "matmul kernel mismatch"

    r_t = jax.random.normal(kr, (37, 200), F32).astype(BF16).astype(F32)
    got = matmul_bias(a_t, b_t, bias_t, relu=True, residual=r_t, out_dtype=F32)
    want = jnp.maximum(a_t @ b_t + bias_t[None, :] + r_t, 0.0)
    assert jnp.allclose(got, want, atol=5e-2, rtol=5e-2), "fused residual mismatch"

    # --- 3x3 tap-accumulation conv kernel vs lax.conv reference (s=1 and s=2).
    kx, kw2, kbc = jax.random.split(jax.random.fold_in(key, 1), 3)
    xt = jax.random.normal(kx, (2, 10, 10, 8), F32).astype(BF16)
    wt = jax.random.normal(kw2, (16, 8, 3, 3), F32).astype(BF16).astype(F32)
    bt = jax.random.normal(kbc, (16,), F32)
    for s in (1, 2):
        got = conv2d_taps(xt, wt, bt, stride=s, padding=1, relu=False).astype(F32)
        want = lax.conv_general_dilated(
            xt.astype(F32), jnp.transpose(wt, (2, 3, 1, 0)),
            window_strides=(s, s), padding=((1, 1), (1, 1)),
            dimension_numbers=("NHWC", "HWIO", "NHWC")) + bt[None, None, None, :]
        assert got.shape == want.shape
        assert jnp.allclose(got, want, atol=0.15, rtol=5e-2), f"conv s={s} mismatch"

    # --- maxpool kernel vs reduce_window reference (exact arithmetic).
    pt = jax.random.normal(jax.random.fold_in(key, 2), (2, 12, 12, 32), F32).astype(BF16)
    got = maxpool3x3_s2(pt)
    want = lax.reduce_window(pt, jnp.array(-jnp.inf, BF16), lax.max,
                             (1, 3, 3, 1), (1, 2, 2, 1),
                             ((0, 0), (1, 1), (1, 1), (0, 0)))
    assert got.shape == want.shape
    assert jnp.allclose(got.astype(F32), want.astype(F32)), "maxpool mismatch"

    # --- Full ResNet-50 forward (ExtractImagePrefix.forward(image_ids=...)).
    params = init_resnet50_params(seed=0)
    image_ids = jax.random.normal(jax.random.PRNGKey(0), (2, 3, 64, 64), F32)

    fwd = jax.jit(resnet50_forward)
    vision_features = fwd(params, image_ids)
    jax.block_until_ready(vision_features)

    assert vision_features.shape == (2, 1000), vision_features.shape
    assert bool(jnp.all(jnp.isfinite(vision_features)))
    print("KERNEL_OK")
</pallas_src>

<mosaic_0001>
module attributes {stable_mosaic.version = 11 : i64} {
  func.func @_matmul_kernel(%arg0: i32, %arg1: i32, %arg2: memref<40x96xbf16, #tpu.memory_space<vmem>>, %arg3: memref<96x256xbf16, #tpu.memory_space<vmem>>, %arg4: memref<1x256xf32, #tpu.memory_space<vmem>>, %arg5: memref<40x256xf32, #tpu.memory_space<vmem>>) attributes {dimension_semantics = [#tpu.dimension_semantics<parallel>, #tpu.dimension_semantics<parallel>], iteration_bounds = array<i64: 1, 1>, scalar_prefetch = 0 : i64, scratch_operands = 0 : i64, tpu.core_type = #tpu.core_type<tc>, window_params = [{transform_indices = @transform_0, window_bounds = array<i64: 40, 96>}, {transform_indices = @transform_1, window_bounds = array<i64: 96, 256>}, {transform_indices = @transform_2, window_bounds = array<i64: 1, 256>}, {transform_indices = @transform_3, window_bounds = array<i64: 40, 256>}]} {
    %c0 = arith.constant 0 : index
    %c0_0 = arith.constant 0 : index
    %0 = vector.load %arg2[%c0, %c0_0] : memref<40x96xbf16, #tpu.memory_space<vmem>>, vector<40x96xbf16>
    %c0_1 = arith.constant 0 : index
    %c0_2 = arith.constant 0 : index
    %1 = vector.load %arg3[%c0_1, %c0_2] : memref<96x256xbf16, #tpu.memory_space<vmem>>, vector<96x256xbf16>
    %cst = arith.constant dense<0.000000e+00> : vector<40x256xf32>
    %2 = tpu.matmul %0, %1, %cst {dimension_numbers = #tpu.dot_dimension_numbers<[1], [0], [0], [1], [0, 0, 1, 1], [], []>} : vector<40x96xbf16>, vector<96x256xbf16>, vector<40x256xf32> -> vector<40x256xf32>
    %c0_3 = arith.constant 0 : index
    %c0_4 = arith.constant 0 : index
    %3 = vector.load %arg4[%c0_3, %c0_4] : memref<1x256xf32, #tpu.memory_space<vmem>>, vector<1x256xf32>
    %4 = vector.broadcast %3 : vector<1x256xf32> to vector<40x256xf32>
    %5 = arith.addf %2, %4 : vector<40x256xf32>
    %cst_5 = arith.constant 0.000000e+00 : f32
    %6 = vector.broadcast %cst_5 : f32 to vector<40x256xf32>
    %7 = arith.maximumf %5, %6 : vector<40x256xf32>
    %c0_6 = arith.constant 0 : index
    %c0_7 = arith.constant 0 : index
    %8 = vector.load %arg5[%c0_6, %c0_7] : memref<40x256xf32, #tpu.memory_space<vmem>>, vector<40x256xf32>
    tpu.vector_store %arg5[%c0_6, %c0_7], %7 {strides = array<i32>} : memref<40x256xf32, #tpu.memory_space<vmem>>, vector<40x256xf32>,
    return
  }
  func.func @transform_0(%arg0: i32, %arg1: i32) -> (i32, i32) {
    %c0_i32 = arith.constant 0 : i32
    %c0_i32_0 = arith.constant 0 : i32
    return %arg0, %c0_i32 : i32, i32
  }
  func.func @transform_1(%arg0: i32, %arg1: i32) -> (i32, i32) {
    %c0_i32 = arith.constant 0 : i32
    %c0_i32_0 = arith.constant 0 : i32
    return %c0_i32, %arg1 : i32, i32
  }
  func.func @transform_2(%arg0: i32, %arg1: i32) -> (i32, i32) {
    %c0_i32 = arith.constant 0 : i32
    %c0_i32_0 = arith.constant 0 : i32
    return %c0_i32, %arg1 : i32, i32
  }
  func.func @transform_3(%arg0: i32, %arg1: i32) -> (i32, i32) {
    %c0_i32 = arith.constant 0 : i32
    return %arg0, %arg1 : i32, i32
  }
}

</mosaic_0001>

<bundles_post_ra>
// kernel: tpu_custom_call.1
= control target key start
LH: loop header
LB: loop body
LE: loop exit
PB: predicated region body
PF: predicated region fallthrough
CT: control target
= control target key end

     0   :  { %8 = vsyncpa [#allocation3], 0  ;;  %s457_s0 = inlined_call_operand.hbm [shape: bf16[40,96], index: 0, kind: input, shape index: {}]   ;;  %s458_s1 = inlined_call_operand.hbm [shape: bf16[96,256], index: 1, kind: input, shape index: {}]   ;;  %s459_s2 = inlined_call_operand.vmem [shape: f32[1,256], index: 2, kind: input, shape index: {}]   ;;  %s460_s3 = inlined_call_operand.hbm [shape: f32[40,256], index: 3, kind: output, shape index: {}]  }
   0x1   :  { %9 = vsyncpa [#allocation6], 0 }
   0x2   :  { %10 = vsyncpa [#allocation4], 0  ;;  %s388_s12 = smov [#allocation2]   ;;  %s316_s16 = scalar_lea.hbm %s457_s0, 320 }
   0x3   :  { %s16_s13 = sshll.u32 %s388_s12, 4  ;;  %p317_p0 = scmp.ne.s32.totalorder %s457_s0, %s316_s16  ;;  %s17_s13 = int_to_ptr.vmem [resolvable:$true] %s16_s13 }
   0x4   :  { %p320_p1 = scmp.lt.u32.totalorder %s316_s16, %s457_s0 }
   0x6   :  { %p322_p2 = pnand %p320_p1, %p317_p0 }
   0x8   :  { %325 = shalt.err (!%p322_p2)
}
   0x9   :  { %s326_s21 = scalar_lea.vmem %s17_s13, 320  ;;  %p331_p4 = scmp.lt.s32.totalorder %s17_s13, %s17_s13 }
   0xa   :  { %p327_p3 = scmp.ne.s32.totalorder %s17_s13, %s326_s21  ;;  %p332_p5 = scmp.lt.s32.totalorder %s326_s21, %s326_s21 }
   0xc   :  { %p333_p6 = por %p332_p5, %p331_p4 }
   0xe   :  { %p334_p7 = pnand %p333_p6, %p327_p3 }
  0x10   :  { %337 = shalt.err (!%p334_p7)
}
  0x11   :  { %s389_s22 = smov 64   ;;  %s390_s23 = smov 4  }
  0x12   :  { %22 = dma.hbm_to_vmem [thread:$0]  %s457_s0, 320, %s17_s13, [#allocation3], %s389_s22, %s389_s22, %s390_s23  }
  0x13   :  { %s391_s26 = smov [#allocation5]   ;;  %s338_s30 = scalar_lea.hbm %s458_s1, 1536 }
  0x14   :  { %s28_s27 = sshll.u32 %s391_s26, 4  ;;  %p339_p8 = scmp.ne.s32.totalorder %s458_s1, %s338_s30  ;;  %s29_s27 = int_to_ptr.vmem [resolvable:$true] %s28_s27 }
  0x15   :  { %p342_p9 = scmp.lt.u32.totalorder %s338_s30, %s458_s1 }
  0x17   :  { %p344_p10 = pnand %p342_p9, %p339_p8 }
  0x19   :  { %347 = shalt.err (!%p344_p10)
}
  0x1a   :  { %s348_s8 = scalar_lea.vmem %s29_s27, 1536  ;;  %p353_p12 = scmp.lt.s32.totalorder %s29_s27, %s29_s27 }
  0x1b   :  { %p349_p11 = scmp.ne.s32.totalorder %s29_s27, %s348_s8  ;;  %p354_p13 = scmp.lt.s32.totalorder %s348_s8, %s348_s8 }
  0x1d   :  { %p355_p0 = por %p354_p13, %p353_p12 }
  0x1f   :  { %p356_p1 = pnand %p355_p0, %p349_p11 }
  0x21   :  { %359 = shalt.err (!%p356_p1)
}
  0x22   :  { %s392_s0 = smov 128   ;;  %s393_s9 = smov 8  }
  0x23   :  { %34 = dma.hbm_to_vmem [thread:$0]  %s458_s1, 1536, %s29_s27, [#allocation6], %s392_s0, %s392_s0, %s393_s9  }
  0x24   :  { %382 = dma.done.wait [#allocation3], 320  }
  0x25   :  { %383 = vsyncadd [#allocation3], 4294966976 }
  0x26   :  { %384 = dma.done.wait [#allocation6], 1536  }
  0x27   :  { %385 = vsyncadd [#allocation6], 4294965760  ;;  %v394_v0 = vmov 0   ;;  %v295_v1 = vld [vmem:[#allocation5 + $0x4] ss:$8 sps:$4 sm:$0xff]   ;;  %v313_v13 = vld [vmem:[#allocation2 + $0x8] sm:$0xff]   ;;  %v63_v16 = vlaneseq }
  0x28   :  { %198 = vmatprep.mubr.bf16.mxu1 %v394_v0  ;;  %188 = vmatprep.mubr.bf16.mxu0 %v394_v0  ;;  %v297_v2 = vld [vmem:[#allocation5] ss:$8 sps:$4 sm:$0xff]   ;;  %v298_v3 = vld [vmem:[#allocation5 + $0x14] ss:$8 sps:$4 sm:$0xff]   ;;  %v300_v4 = vld [vmem:[#allocation5 + $0x10] ss:$8 sps:$4 sm:$0xff]  }
  0x29   :  { %273 = vmatprep.subr.bf16.mxu1 %v295_v1  ;;  %156 = vmatprep.subr.bf16.mxu0 %v295_v1  ;;  %v301_v5 = vld [vmem:[#allocation5 + $0x24] ss:$8 sps:$4 sm:$0xff]   ;;  %v303_v6 = vld [vmem:[#allocation5 + $0x20] ss:$8 sps:$4 sm:$0xff]   ;;  %v304_v7 = vld [vmem:[#allocation5 + $0x34] ss:$8 sps:$4 sm:$0xff]  }
  0x2a   :  { %279 = vmatpush1.bf16.msra.mxu1 %v297_v2  ;;  %157 = vmatpush1.bf16.msra.mxu0 %v297_v2  ;;  %v306_v8 = vld [vmem:[#allocation5 + $0x30] ss:$8 sps:$4 sm:$0xff]   ;;  %v307_v9 = vld [vmem:[#allocation5 + $0x44] ss:$8 sps:$4 sm:$0xff]   ;;  %v309_v10 = vld [vmem:[#allocation5 + $0x40] ss:$8 sps:$4 sm:$0xff]  }
  0x2b   :  { %274 = vmatprep.subr.bf16.mxu1 %v298_v3  ;;  %158 = vmatprep.subr.bf16.mxu0 %v298_v3  ;;  %v310_v11 = vld [vmem:[#allocation5 + $0x54] ss:$8 sps:$4 sm:$0xff]   ;;  %v312_v12 = vld [vmem:[#allocation5 + $0x50] ss:$8 sps:$4 sm:$0xff]   ;;  %vm146_vm0 = vcmask 785408   ;;  %v64_v17 = vshrl.u32 %v63_v16, 7 }
  0x2c   :  { %v314_v14 = vld [vmem:[#allocation2] sm:$0xff]   ;;  %v315_v15 = vld [vmem:[#allocation2 + $0x10] ss:$0 sps:$4 sm:$0xff]  }
  0x2d   :  { %v65_v18 = vsub.s32 0, %v64_v17  ;;  %v61_v19 = vld [vmem:[%s459_s2] sm:$0x3]  ;;  %v69_v20 = vsub.s32 1, %v64_v17  ;;  %s395_s2 = smov [#allocation7]  }
  0x2e   :  { %280 = vmatpush1.bf16.msra.mxu1 %v300_v4  ;;  %159 = vmatpush1.bf16.msra.mxu0 %v300_v4  ;;  %s242_s13 = sshll.u32 %s395_s2, 4  ;;  %s243_s13 = int_to_ptr.vmem [resolvable:$true] %s242_s13 }
  0x2f   :  { %275 = vmatprep.subr.bf16.mxu1 %v301_v5  ;;  %160 = vmatprep.subr.bf16.mxu0 %v301_v5  ;;  %v66_v21 = vrot.slane %v61_v19, %v65_v18  ;;  %v70_v22 = vrot.slane %v61_v19, %v69_v20  ;;  %s360_s14 = scalar_lea.vmem %s243_s13, 1280  ;;  %p365_p3 = scmp.lt.s32.totalorder %s243_s13, %s243_s13 }
  0x30   :  { %p361_p2 = scmp.ne.s32.totalorder %s243_s13, %s360_s14  ;;  %p366_p4 = scmp.lt.s32.totalorder %s360_s14, %s360_s14 }
  0x32   :  { %281 = vmatpush1.bf16.msra.mxu1 %v303_v6  ;;  %161 = vmatpush1.bf16.msra.mxu0 %v303_v6  ;;  %p367_p5 = por %p366_p4, %p365_p3 }
  0x33   :  { %276 = vmatprep.subr.bf16.mxu1 %v304_v7  ;;  %162 = vmatprep.subr.bf16.mxu0 %v304_v7 }
  0x34   :  { %p368_p6 = pnand %p367_p5, %p361_p2 }
  0x36   :  { %282 = vmatpush1.bf16.msra.mxu1 %v306_v8  ;;  %163 = vmatpush1.bf16.msra.mxu0 %v306_v8 }
  0x37   :  { %277 = vmatprep.subr.bf16.mxu1 %v307_v9  ;;  %164 = vmatprep.subr.bf16.mxu0 %v307_v9 }
  0x3a   :  { %283 = vmatpush1.bf16.msra.mxu1 %v309_v10  ;;  %165 = vmatpush1.bf16.msra.mxu0 %v309_v10 }
  0x3b   :  { %278 = vmatprep.subr.bf16.mxu1 %v310_v11  ;;  %166 = vmatprep.subr.bf16.mxu0 %v310_v11 }
  0x3e   :  { %284 = vmatpush1.bf16.msra.mxu1 %v312_v12  ;;  %167 = vmatpush1.bf16.msra.mxu0 %v312_v12 }
  0x41   :  { %271 = vmatmul.mubr.msk.bf16.vlgmr.msra.gmra.mrb[0].mxu1 %vm146_vm0, %v313_v13  ;;  %270 = vmatmul.mubr.msk.bf16.vlgmr.msra.gmra.mrb[0].mxu0 %vm146_vm0, %v314_v14 }
  0x42   :  { %208 = vmatprep.mubr.bf16.mxu1 %v394_v0 }
  0x49   :  { %272 = vmatmul.mubr.msk.bf16.gmra.mrb[4].mxu1 %vm146_vm0, %v315_v15 }
 0x114   :  { %v200_v23 = vpop.f32.mrb[0].mxu1  ;;  %v190_v24 = vpop.f32.mrb[0].mxu0 }
 0x115   :  { %v201_v25 = vadd.f32 %v200_v23, %v66_v21  ;;  %v202_v26 = vpop.f32.mrb[1].mxu1  ;;  %v191_v27 = vadd.f32 %v190_v24, %v66_v21  ;;  %v192_v28 = vpop.f32.mrb[1].mxu0 }
 0x116   :  { %v203_v29 = vadd.f32 %v202_v26, %v70_v22  ;;  %v204_v30 = vpop.f32.mrb[2].mxu1  ;;  %v193_v31 = vadd.f32 %v192_v28, %v70_v22  ;;  %v194_v32 = vpop.f32.mrb[2].mxu0 }
 0x117   :  { %v221_v33 = vmax.f32 %v201_v25, 0.0  ;;  %v205_v34 = vadd.f32 %v204_v30, %v66_v21  ;;  %v217_v35 = vmax.f32 %v191_v27, 0.0  ;;  %v206_v36 = vpop.f32.mrb[3].mxu1  ;;  %v195_v37 = vadd.f32 %v194_v32, %v66_v21  ;;  %v196_v38 = vpop.f32.mrb[3].mxu0 }
 0x118   :  { %v222_v39 = vmax.f32 %v203_v29, 0.0  ;;  %v207_v40 = vadd.f32 %v206_v36, %v70_v22  ;;  %v218_v41 = vmax.f32 %v193_v31, 0.0  ;;  %v197_v42 = vadd.f32 %v196_v38, %v70_v22 }
 0x119   :  { %231 = vst [vmem:[#allocation7 + $0x20] sm:$0xff] %v221_v33  ;;  %v223_v43 = vmax.f32 %v205_v34, 0.0  ;;  %227 = vst [vmem:[#allocation7] sm:$0xff] %v217_v35  ;;  %v219_v44 = vmax.f32 %v195_v37, 0.0 }
 0x11a   :  { %232 = vst [vmem:[#allocation7 + $0x28] sm:$0xff] %v222_v39  ;;  %v224_v45 = vmax.f32 %v207_v40, 0.0  ;;  %228 = vst [vmem:[#allocation7 + $0x8] sm:$0xff] %v218_v41  ;;  %v220_v46 = vmax.f32 %v197_v42, 0.0 }
 0x11b   :  { %233 = vst [vmem:[#allocation7 + $0x30] sm:$0xff] %v223_v43  ;;  %229 = vst [vmem:[#allocation7 + $0x10] sm:$0xff] %v219_v44 }
 0x11c   :  { %234 = vst [vmem:[#allocation7 + $0x38] sm:$0xff] %v224_v45  ;;  %230 = vst [vmem:[#allocation7 + $0x18] sm:$0xff] %v220_v46  ;;  %v210_v47 = vpop.f32.mrb[4].mxu1 }
 0x11d   :  { %v211_v48 = vadd.f32 %v210_v47, %v66_v21  ;;  %v212_v49 = vpop.f32.mrb[5].mxu1 }
 0x11e   :  { %v213_v50 = vadd.f32 %v212_v49, %v70_v22  ;;  %v214_v51 = vpop.f32.mrb[6].mxu1 }
 0x11f   :  { %v225_v52 = vmax.f32 %v211_v48, 0.0  ;;  %v215_v53 = vpop.f32.mrb[7].mxu1 }
 0x120   :  { %v226_v54 = vmax.f32 %v213_v50, 0.0 }
 0x121   :  { %235 = vst [vmem:[#allocation7 + $0x40] sm:$0xff] %v225_v52 }
 0x122   :  { %236 = vst [vmem:[#allocation7 + $0x48] sm:$0xff] %v226_v54 }
 0x123   :  { %371 = shalt.err (!%p368_p6)
}
 0x124   :  { %s372_s17 = scalar_lea.hbm %s460_s3, 1280 }
 0x125   :  { %p373_p7 = scmp.ne.s32.totalorder %s460_s3, %s372_s17  ;;  %p376_p8 = scmp.lt.u32.totalorder %s372_s17, %s460_s3 }
 0x127   :  { %p378_p9 = pnand %p376_p8, %p373_p7 }
 0x129   :  { %381 = shalt.err (!%p378_p9)
}
 0x12a   :  { %s396_s22 = smov 256   ;;  %s397_s23 = smov 16  }
 0x12b   :  { %248 = dma.vmem_to_hbm [thread:$0]  %s243_s13, 1280, %s460_s3, [#allocation4], %s396_s22, %s396_s22, %s397_s23  }
 0x12c   :  { %386 = dma.done.wait [#allocation4], 1280  }
 0x12d   :  { %387 = vsyncadd [#allocation4], 4294966016 }
 0x12e   :  { %252 = vsyncpa [#allocation3], 1 }
 0x12f   :  { %253 = vsyncpa [#allocation6], 1 }
 0x130   :  { %254 = vsyncpa [#allocation4], 1 }

</bundles_post_ra>
